<compile_context>
chip_gen: v7x
topology: tpu7x:2x2x1
jax: 0.10.0
libtpu: 0.0.40
codegen_flags: <defaults>
</compile_context>

<pallas_src>
import jax
import jax.numpy as jnp
from jax.experimental import pallas as pl
from jax.experimental.pallas import tpu as pltpu

_LANE = 128                      # lane width: output / weight N padded to 128
_TM_MAX = 512                    # max batch tile (multiple of 8)
_TK_MAX = 2048                   # max contraction tile (multiple of 128)
_RESIDENT_W_BYTES = 4 * 1024 * 1024   # keep W^T fully resident in VMEM if <= 4 MiB


def _make_kernel(tk, nk, slice_w):
    """Kernel: one (TM,TK) x (TK,128) bf16 MXU step, f32 accumulate into o_ref."""

    def kernel(x_ref, w_ref, b_ref, o_ref):
        k = pl.program_id(1)

        if slice_w:
            # W^T is fully resident; take the current K slice in-VMEM.
            start = pl.multiple_of(k * tk, tk)
            w_tile = w_ref[pl.ds(start, tk), :]
        else:
            w_tile = w_ref[...]

        # Cast the streamed x tile to the weight dtype (bf16) -> single-pass MXU,
        # accumulate in f32 via preferred_element_type.
        partial = jnp.dot(x_ref[...].astype(w_tile.dtype), w_tile,
                          preferred_element_type=jnp.float32)

        if nk == 1:
            # Common case (dim_p <= 2048): single fused store, no init/copy.
            o_ref[...] = (partial + b_ref[...]).astype(o_ref.dtype)
        else:
            # Output block is resident across the k axis -> accumulate in place.
            @pl.when(k == 0)
            def _():
                o_ref[...] = (partial + b_ref[...]).astype(o_ref.dtype)

            @pl.when(k > 0)
            def _():
                o_ref[...] = o_ref[...] + partial.astype(o_ref.dtype)

    return kernel


def prepare_linear_params(weight, bias, weight_dtype=jnp.bfloat16):
    """One-time parameter prep (the 'init' step of the classifier head).

    weight: (num_labels, dim) f32, bias: (num_labels,) f32.
    Returns W^T (bf16) zero-padded to (dim_p, 128*ceil(labels/128)) and bias
    (f32) padded to (1, same), with dim_p a multiple of 128.
    """
    num_labels, dim = weight.shape
    np_pad = max(_LANE, pl.cdiv(num_labels, _LANE) * _LANE)
    dim_p = pl.cdiv(dim, _LANE) * _LANE
    w_t = jnp.zeros((dim_p, np_pad), weight_dtype)
    w_t = w_t.at[:dim, :num_labels].set(weight.T.astype(weight_dtype))
    b_p = jnp.zeros((1, np_pad), jnp.float32)
    b_p = b_p.at[0, :num_labels].set(bias.astype(jnp.float32))
    return w_t, b_p


def linear_classifier_forward(x, w_t_padded, b_padded, num_labels):
    """x: (B, ...) f32; w_t_padded: (dim_p, NP) bf16; b_padded: (1, NP) f32."""
    B = x.shape[0]
    x2d = x.reshape(B, -1)                      # same as torch .view(B, -1)
    dim = x2d.shape[1]
    dim_p, NP = w_t_padded.shape

    # ---- batch tiling --------------------------------------------------------
    if B <= 8:
        tm = B                                   # full-extent block (one tile)
    elif B <= _TM_MAX:
        # split into >= 2 tiles so v7x can shard the "parallel" axis over 2 TCs
        tm = ((pl.cdiv(B, 2) + 7) // 8) * 8
    else:
        tm = _TM_MAX
    b_pad = (-B) % tm
    Bp = B + b_pad
    nb = Bp // tm

    # ---- K tiling ------------------------------------------------------------
    k_pad = dim_p - dim
    if dim_p <= _TK_MAX:
        tk = dim_p                               # single K step
    else:
        # largest multiple of 128 <= _TK_MAX that divides dim_p
        tk = _LANE
        for m in range(_TK_MAX // _LANE, 0, -1):
            if dim_p % (m * _LANE) == 0:
                tk = m * _LANE
                break
    nk = dim_p // tk

    # Single fused pad over both dims (zero cost when already aligned, which is
    # the common case: dim % 128 == 0 and B a multiple of the batch tile).
    if b_pad or k_pad:
        x2d = jnp.pad(x2d, ((0, b_pad), (0, k_pad)))

    # ---- weight residency ----------------------------------------------------
    w_bytes = dim_p * NP * w_t_padded.dtype.itemsize
    resident_w = w_bytes <= _RESIDENT_W_BYTES
    if resident_w:
        # constant block index -> fetched exactly once per call
        w_spec = pl.BlockSpec((dim_p, NP), lambda i, k: (0, 0))
    else:
        w_spec = pl.BlockSpec((tk, NP), lambda i, k: (k, 0))
    slice_w = resident_w and nk > 1

    flops = 2 * Bp * dim_p * NP
    bytes_accessed = (Bp * dim_p * x2d.dtype.itemsize
                      + w_bytes
                      + Bp * NP * x2d.dtype.itemsize)

    out = pl.pallas_call(
        _make_kernel(tk, nk, slice_w),
        out_shape=jax.ShapeDtypeStruct((Bp, NP), x2d.dtype),
        grid_spec=pltpu.PrefetchScalarGridSpec(
            num_scalar_prefetch=0,
            grid=(nb, nk),                               # reduction axis last
            in_specs=[
                pl.BlockSpec((tm, tk), lambda i, k: (i, k)),   # x tile (streamed)
                w_spec,                                        # W^T (resident/tiled)
                pl.BlockSpec((1, NP), lambda i, k: (0, 0)),    # bias (resident)
            ],
            out_specs=pl.BlockSpec((tm, NP), lambda i, k: (i, 0)),
        ),
        compiler_params=pltpu.CompilerParams(
            dimension_semantics=("parallel", "arbitrary"),
            vmem_limit_bytes=32 * 1024 * 1024),
        cost_estimate=pl.CostEstimate(flops=flops, transcendentals=0,
                                      bytes_accessed=bytes_accessed),
    )(x2d, w_t_padded, b_padded)

    # Drop batch padding and padded label lanes.
    return out[:B, :num_labels]


if __name__ == "__main__":
    key = jax.random.PRNGKey(0)
    kx, kw = jax.random.split(key)

    # Small shapes consistent with the module: NCHW input, flattened dim = C*H*W.
    B, C, H, W = 2, 4, 16, 16
    dim = C * H * W            # 1024
    num_labels = 10

    x = jax.random.normal(kx, (B, C, H, W), dtype=jnp.float32)

    # Deterministic parameter init matching the module's __init__:
    #   weight ~ N(0, 0.01), bias = 0
    weight = 0.01 * jax.random.normal(kw, (num_labels, dim), dtype=jnp.float32)
    bias = jnp.zeros((num_labels,), dtype=jnp.float32)

    # One-time parameter preparation (padded, pre-transposed, bf16 layout).
    w_t_padded, b_padded = prepare_linear_params(weight, bias)

    y = linear_classifier_forward(x, w_t_padded, b_padded, num_labels)
    jax.block_until_ready(y)

    # Correctness check against plain JAX f32 reference (bf16 weights -> looser tol).
    y_ref = x.reshape(B, -1) @ weight.T + bias
    assert y.shape == (B, num_labels)
    assert jnp.allclose(y, y_ref, atol=2e-2, rtol=2e-2), float(
        jnp.max(jnp.abs(y - y_ref)))

    print("KERNEL_OK")
</pallas_src>

<mosaic_0001>
module attributes {stable_mosaic.version = 11 : i64} {
  func.func @kernel(%arg0: i32, %arg1: i32, %arg2: memref<2x1024xf32, #tpu.memory_space<vmem>>, %arg3: memref<1024x128xbf16, #tpu.memory_space<vmem>>, %arg4: memref<1x128xf32, #tpu.memory_space<vmem>>, %arg5: memref<2x128xf32, #tpu.memory_space<vmem>>) attributes {dimension_semantics = [#tpu.dimension_semantics<parallel>, #tpu.dimension_semantics<arbitrary>], iteration_bounds = array<i64: 1, 1>, scalar_prefetch = 0 : i64, scratch_operands = 0 : i64, tpu.core_type = #tpu.core_type<tc>, window_params = [{transform_indices = @transform_0, window_bounds = array<i64: 2, 1024>}, {pipeline_mode = #tpu.pipeline_mode<synchronous>, transform_indices = @transform_1, window_bounds = array<i64: 1024, 128>}, {pipeline_mode = #tpu.pipeline_mode<synchronous>, transform_indices = @transform_2, window_bounds = array<i64: 1, 128>}, {transform_indices = @transform_3, window_bounds = array<i64: 2, 128>}]} {
    %c0 = arith.constant 0 : index
    %c0_0 = arith.constant 0 : index
    %0 = vector.load %arg3[%c0, %c0_0] : memref<1024x128xbf16, #tpu.memory_space<vmem>>, vector<1024x128xbf16>
    %c0_1 = arith.constant 0 : index
    %c0_2 = arith.constant 0 : index
    %1 = vector.load %arg2[%c0_1, %c0_2] : memref<2x1024xf32, #tpu.memory_space<vmem>>, vector<2x1024xf32>
    %2 = arith.truncf %1 : vector<2x1024xf32> to vector<2x1024xbf16>
    %cst = arith.constant dense<0.000000e+00> : vector<2x128xf32>
    %3 = tpu.matmul %2, %0, %cst {dimension_numbers = #tpu.dot_dimension_numbers<[1], [0], [0], [1], [0, 0, 1, 1], [], []>} : vector<2x1024xbf16>, vector<1024x128xbf16>, vector<2x128xf32> -> vector<2x128xf32>
    %c0_3 = arith.constant 0 : index
    %c0_4 = arith.constant 0 : index
    %4 = vector.load %arg4[%c0_3, %c0_4] : memref<1x128xf32, #tpu.memory_space<vmem>>, vector<1x128xf32>
    %5 = vector.broadcast %4 : vector<1x128xf32> to vector<2x128xf32>
    %6 = arith.addf %3, %5 : vector<2x128xf32>
    %c0_5 = arith.constant 0 : index
    %c0_6 = arith.constant 0 : index
    %7 = vector.load %arg5[%c0_5, %c0_6] : memref<2x128xf32, #tpu.memory_space<vmem>>, vector<2x128xf32>
    tpu.vector_store %arg5[%c0_5, %c0_6], %6 {strides = array<i32>} : memref<2x128xf32, #tpu.memory_space<vmem>>, vector<2x128xf32>,
    return
  }
  func.func @transform_0(%arg0: i32, %arg1: i32) -> (i32, i32) {
    %c0_i32 = arith.constant 0 : i32
    return %arg0, %arg1 : i32, i32
  }
  func.func @transform_1(%arg0: i32, %arg1: i32) -> (i32, i32) {
    %c0_i32 = arith.constant 0 : i32
    %c0_i32_0 = arith.constant 0 : i32
    %c0_i32_1 = arith.constant 0 : i32
    return %c0_i32, %c0_i32_0 : i32, i32
  }
  func.func @transform_2(%arg0: i32, %arg1: i32) -> (i32, i32) {
    %c0_i32 = arith.constant 0 : i32
    %c0_i32_0 = arith.constant 0 : i32
    %c0_i32_1 = arith.constant 0 : i32
    return %c0_i32, %c0_i32_0 : i32, i32
  }
  func.func @transform_3(%arg0: i32, %arg1: i32) -> (i32, i32) {
    %c0_i32 = arith.constant 0 : i32
    %c0_i32_0 = arith.constant 0 : i32
    return %arg0, %c0_i32 : i32, i32
  }
}

</mosaic_0001>

<bundles_post_ra>
// kernel: tpu_custom_call.1
= control target key start
LH: loop header
LB: loop body
LE: loop exit
PB: predicated region body
PF: predicated region fallthrough
CT: control target
= control target key end

     0   :  { %8 = vsyncpa [#allocation3], 0  ;;  %s1167_s0 = inlined_call_operand.hbm [shape: f32[2,1024], index: 0, kind: input, shape index: {}]   ;;  %s1168_s1 = inlined_call_operand.hbm [shape: bf16[1024,128], index: 1, kind: input, shape index: {}]   ;;  %s1169_s2 = inlined_call_operand.vmem [shape: f32[1,128], index: 2, kind: input, shape index: {}]   ;;  %s1170_s3 = inlined_call_operand.hbm [shape: f32[2,128], index: 3, kind: output, shape index: {}]  }
   0x1   :  { %9 = vsyncpa [#allocation6], 0 }
   0x2   :  { %10 = vsyncpa [#allocation4], 0  ;;  %s1089_s12 = smov [#allocation2]   ;;  %s1090_s14 = smov [#allocation5]  }
   0x3   :  { %s17_s13 = sshll.u32 %s1089_s12, 4  ;;  %s26_s15 = sshll.u32 %s1090_s14, 4  ;;  %s18_s13 = int_to_ptr.vmem [resolvable:$true] %s17_s13  ;;  %s1115_s15 = int_to_ptr.vmem [resolvable:$true] %s26_s15 }
   0x4   :  { %s1017_s18 = scalar_lea.hbm %s1167_s0, 256 }
   0x5   :  { %p1018_p0 = scmp.ne.s32.totalorder %s1167_s0, %s1017_s18  ;;  %p1021_p1 = scmp.lt.u32.totalorder %s1017_s18, %s1167_s0 }
   0x7   :  { %p1023_p2 = pnand %p1021_p1, %p1018_p0 }
   0x9   :  { %1026 = shalt.err (!%p1023_p2)
}
   0xa   :  { %s1027_s23 = scalar_lea.vmem %s18_s13, 256  ;;  %p1032_p4 = scmp.lt.s32.totalorder %s18_s13, %s18_s13 }
   0xb   :  { %p1028_p3 = scmp.ne.s32.totalorder %s18_s13, %s1027_s23  ;;  %p1033_p5 = scmp.lt.s32.totalorder %s1027_s23, %s1027_s23 }
   0xd   :  { %p1034_p6 = por %p1033_p5, %p1032_p4 }
   0xf   :  { %p1035_p7 = pnand %p1034_p6, %p1028_p3 }
  0x11   :  { %1038 = shalt.err (!%p1035_p7)
}
  0x12   :  { %20 = dma.hbm_to_vmem [thread:$0]  %s1167_s0, 256, %s18_s13, [#allocation3]  }
  0x13   :  { %s1039_s28 = scalar_lea.hbm %s1168_s1, 8192 }
  0x14   :  { %p1040_p8 = scmp.ne.s32.totalorder %s1168_s1, %s1039_s28  ;;  %p1043_p9 = scmp.lt.u32.totalorder %s1039_s28, %s1168_s1 }
  0x16   :  { %p1045_p10 = pnand %p1043_p9, %p1040_p8 }
  0x18   :  { %1048 = shalt.err (!%p1045_p10)
}
  0x19   :  { %s1049_s6 = scalar_lea.vmem %s1115_s15, 8192  ;;  %p1054_p12 = scmp.lt.s32.totalorder %s1115_s15, %s1115_s15 }
  0x1a   :  { %p1050_p11 = scmp.ne.s32.totalorder %s1115_s15, %s1049_s6  ;;  %p1055_p13 = scmp.lt.s32.totalorder %s1049_s6, %s1049_s6 }
  0x1c   :  { %p1056_p0 = por %p1055_p13, %p1054_p12 }
  0x1e   :  { %p1057_p1 = pnand %p1056_p0, %p1050_p11 }
  0x20   :  { %1060 = shalt.err (!%p1057_p1)
}
  0x21   :  { %s1091_s0 = smov 64   ;;  %s1092_s7 = smov 4  }
  0x22   :  { %32 = dma.hbm_to_vmem [thread:$0]  %s1168_s1, 8192, %s1115_s15, [#allocation6], %s1091_s0, %s1091_s0, %s1092_s7  }
  0x23   :  { %1083 = dma.done.wait [#allocation3], 256  }
  0x24   :  { %1084 = vsyncadd [#allocation3], 4294967040 }
  0x25   :  { %1085 = dma.done.wait [#allocation6], 8192  }
  0x26   :  { %1086 = vsyncadd [#allocation6], 4294959104  ;;  %v951_v0 = vld [vmem:[#allocation5 + $0x40] sm:$0xff]   ;;  %v955_v4 = vld [vmem:[#allocation5 + $0x48] sm:$0xff]   ;;  %v1093_v22 = vmov 1983009808   ;;  %v178_v24 = vlaneseq }
  0x27   :  { %v952_v1 = vld [vmem:[#allocation5 + $0xc0] sm:$0xff]   ;;  %857 = vmatprep.subr.bf16.mxu0 %v951_v0  ;;  %v956_v5 = vld [vmem:[#allocation5 + $0xc8] sm:$0xff]   ;;  %v959_v8 = vld [vmem:[#allocation5 + $0x50] sm:$0xff]   ;;  %v176_v23 = vunpack.c.l.s4 %v1093_v22  ;;  %s1094_s11 = smov [#allocation7]  }
  0x28   :  { %v953_v2 = vld [vmem:[#allocation5] sm:$0xff]   ;;  %879 = vmatprep.subr.bf16.mxu1 %v952_v1  ;;  %v957_v6 = vld [vmem:[#allocation5 + $0x8] sm:$0xff]   ;;  %v960_v9 = vld [vmem:[#allocation5 + $0xd0] sm:$0xff]   ;;  %v179_v30 = vshrl.u32 %v178_v24, 7 }
  0x29   :  { %v954_v3 = vld [vmem:[#allocation5 + $0x80] sm:$0xff]   ;;  %858 = vmatpush3.bf16.msra.mxu0 %v953_v2  ;;  %v958_v7 = vld [vmem:[#allocation5 + $0x88] sm:$0xff]   ;;  %v961_v10 = vld [vmem:[#allocation5 + $0x10] sm:$0xff]   ;;  %v177_v29 = vunpack.c.0.s8 %v176_v23 }
  0x2a   :  { %880 = vmatpush3.bf16.msra.mxu1 %v954_v3  ;;  %859 = vmatprep.subr.bf16.mxu0 %v955_v4  ;;  %v962_v11 = vld [vmem:[#allocation5 + $0x90] sm:$0xff]   ;;  %v963_v12 = vld [vmem:[#allocation5 + $0x58] sm:$0xff]   ;;  %v967_v16 = vld [vmem:[#allocation5 + $0x60] sm:$0xff]  }
  0x2b   :  { %881 = vmatprep.subr.bf16.mxu1 %v956_v5  ;;  %v964_v13 = vld [vmem:[#allocation5 + $0xd8] sm:$0xff]   ;;  %v968_v17 = vld [vmem:[#allocation5 + $0xe0] sm:$0xff]   ;;  %v971_v20 = vld [vmem:[#allocation5 + $0x68] sm:$0xff]   ;;  %v1146_v35 = vsub.s32 %v177_v29, %v179_v30 }
  0x2c   :  { %v965_v14 = vld [vmem:[#allocation5 + $0x18] sm:$0xff]   ;;  %v969_v18 = vld [vmem:[#allocation5 + $0x20] sm:$0xff]   ;;  %v972_v21 = vld [vmem:[#allocation5 + $0xe8] sm:$0xff]  }
  0x2d   :  { %860 = vmatpush3.bf16.msra.mxu0 %v957_v6  ;;  %v966_v15 = vld [vmem:[#allocation5 + $0x98] sm:$0xff]   ;;  %v970_v19 = vld [vmem:[#allocation5 + $0xa0] sm:$0xff]   ;;  %v973_v25 = vld [vmem:[#allocation5 + $0x28] sm:$0xff]  }
  0x2e   :  { %882 = vmatpush3.bf16.msra.mxu1 %v958_v7  ;;  %861 = vmatprep.subr.bf16.mxu0 %v959_v8  ;;  %v974_v26 = vld [vmem:[#allocation5 + $0xa8] sm:$0xff]   ;;  %v975_v27 = vld [vmem:[#allocation5 + $0x70] sm:$0xff]   ;;  %v979_v33 = vld [vmem:[#allocation5 + $0x78] sm:$0xff]  }
  0x2f   :  { %883 = vmatprep.subr.bf16.mxu1 %v960_v9  ;;  %v976_v28 = vld [vmem:[#allocation5 + $0xf0] sm:$0xff]   ;;  %v980_v34 = vld [vmem:[#allocation5 + $0xf8] sm:$0xff]   ;;  %v984_v41 = vld [vmem:[#allocation5 + $0x140] sm:$0xff]  }
  0x30   :  { %v977_v31 = vld [vmem:[#allocation5 + $0x30] sm:$0xff]   ;;  %v981_v36 = vld [vmem:[#allocation5 + $0x38] sm:$0xff]   ;;  %v985_v42 = vld [vmem:[#allocation5 + $0x1c0] sm:$0xff]  }
  0x31   :  { %862 = vmatpush3.bf16.msra.mxu0 %v961_v10  ;;  %v978_v32 = vld [vmem:[#allocation5 + $0xb0] sm:$0xff]   ;;  %v982_v37 = vld [vmem:[#allocation5 + $0xb8] sm:$0xff]   ;;  %v986_v48 = vld [vmem:[#allocation5 + $0x100] sm:$0xff]  }
  0x32   :  { %884 = vmatpush3.bf16.msra.mxu1 %v962_v11  ;;  %863 = vmatprep.subr.bf16.mxu0 %v963_v12  ;;  %v170_v38 = vld [vmem:[#allocation2] sm:$0xff]  ;;  %v988_v50 = vld [vmem:[#allocation5 + $0x148] sm:$0xff]   ;;  %v987_v52 = vld [vmem:[#allocation5 + $0x180] sm:$0xff]  }
  0x33   :  { %885 = vmatprep.subr.bf16.mxu1 %v964_v13  ;;  %v181_v39 = vrot.slane %v170_v38, %v1146_v35  ;;  %v174_v40 = vcombine.high %v170_v38, %v170_v38  ;;  %v989_v53 = vld [vmem:[#allocation5 + $0x1c8] sm:$0xff]   ;;  %v992_v55 = vld [vmem:[#allocation5 + $0x150] sm:$0xff]   ;;  %v996_v59 = vld [vmem:[#allocation5 + $0x158] sm:$0xff]  }
  0x34   :  { %v990_v54 = vld [vmem:[#allocation5 + $0x108] sm:$0xff]   ;;  %v993_v57 = vld [vmem:[#allocation5 + $0x1d0] sm:$0xff]   ;;  %v997_v61 = vld [vmem:[#allocation5 + $0x1d8] sm:$0xff]  }
  0x35   :  { %864 = vmatpush3.bf16.msra.mxu0 %v965_v14  ;;  %v189_v43 = vcombine.high %v181_v39, %v181_v39  ;;  %v188_v44 = vrot.slane %v174_v40, %v1146_v35  ;;  %v216_v45 = vpack.c.bf16 %v181_v39, %v181_v39  ;;  %v991_v56 = vld [vmem:[#allocation5 + $0x188] sm:$0xff]   ;;  %v994_v58 = vld [vmem:[#allocation5 + $0x110] sm:$0xff]   ;;  %v998_v62 = vld [vmem:[#allocation5 + $0x118] sm:$0xff]  }
  0x36   :  { %886 = vmatpush3.bf16.msra.mxu1 %v966_v15  ;;  %865 = vmatprep.subr.bf16.mxu0 %v967_v16  ;;  %v995_v60 = vld [vmem:[#allocation5 + $0x190] sm:$0xff]   ;;  %v1000_v63 = vld [vmem:[#allocation5 + $0x160] sm:$0xff]   ;;  %v999_v0 = vld [vmem:[#allocation5 + $0x198] sm:$0xff]  }
  0x37   :  { %887 = vmatprep.subr.bf16.mxu1 %v968_v17  ;;  %v217_v46 = vpack.c.bf16 %v189_v43, %v189_v43  ;;  %v190_v47 = vcombine.high %v188_v44, %v188_v44  ;;  %v218_v49 = vpack.c.bf16 %v188_v44, %v188_v44  ;;  %v1001_v1 = vld [vmem:[#allocation5 + $0x1e0] sm:$0xff]   ;;  %v1004_v3 = vld [vmem:[#allocation5 + $0x168] sm:$0xff]   ;;  %v1008_v7 = vld [vmem:[#allocation5 + $0x170] sm:$0xff]  }
  0x38   :  { %v1002_v2 = vld [vmem:[#allocation5 + $0x120] sm:$0xff]   ;;  %v1005_v5 = vld [vmem:[#allocation5 + $0x1e8] sm:$0xff]   ;;  %v1009_v9 = vld [vmem:[#allocation5 + $0x1f0] sm:$0xff]  }
  0x39   :  { %866 = vmatpush3.bf16.msra.mxu0 %v969_v18  ;;  %647 = vmatprep.mubr.bf16.mxu0 %v217_v46  ;;  %v219_v51 = vpack.c.bf16 %v190_v47, %v190_v47  ;;  %v1003_v4 = vld [vmem:[#allocation5 + $0x1a0] sm:$0xff]   ;;  %v1006_v6 = vld [vmem:[#allocation5 + $0x128] sm:$0xff]   ;;  %v1010_v10 = vld [vmem:[#allocation5 + $0x130] sm:$0xff]  }
  0x3a   :  { %888 = vmatpush3.bf16.msra.mxu1 %v970_v19  ;;  %867 = vmatprep.subr.bf16.mxu0 %v971_v20  ;;  %v1007_v8 = vld [vmem:[#allocation5 + $0x1a8] sm:$0xff]   ;;  %v1012_v11 = vld [vmem:[#allocation5 + $0x178] sm:$0xff]   ;;  %v1011_v12 = vld [vmem:[#allocation5 + $0x1b0] sm:$0xff]  }
  0x3b   :  { %889 = vmatprep.subr.bf16.mxu1 %v972_v21  ;;  %687 = vmatprep.mubr.bf16.mxu1 %v219_v51  ;;  %v1013_v13 = vld [vmem:[#allocation5 + $0x1f8] sm:$0xff]  }
  0x3c   :  { %v171_v14 = vld [vmem:[#allocation2 + $0x8] sm:$0xff] }
  0x3d   :  { %868 = vmatpush3.bf16.msra.mxu0 %v973_v25  ;;  %v1014_v15 = vld [vmem:[#allocation5 + $0x138] sm:$0xff]   ;;  %v198_v16 = vrot.slane %v171_v14, %v1146_v35  ;;  %v191_v17 = vcombine.high %v171_v14, %v171_v14 }
  0x3e   :  { %890 = vmatpush3.bf16.msra.mxu1 %v974_v26  ;;  %869 = vmatprep.subr.bf16.mxu0 %v975_v27  ;;  %v1015_v18 = vld [vmem:[#allocation5 + $0x1b8] sm:$0xff]   ;;  %v792_v27 = vld [vmem:[%s1169_s2] ss:$0 sm:$0xff]  ;;  %s782_s2 = sshll.u32 %s1094_s11, 4  ;;  %s783_s2 = int_to_ptr.vmem [resolvable:$true] %s782_s2 }
  0x3f   :  { %891 = vmatprep.subr.bf16.mxu1 %v976_v28  ;;  %v206_v19 = vcombine.high %v198_v16, %v198_v16  ;;  %v205_v20 = vrot.slane %v191_v17, %v1146_v35  ;;  %v220_v21 = vpack.c.bf16 %v198_v16, %v198_v16  ;;  %s1061_s12 = scalar_lea.vmem %s783_s2, 32  ;;  %p1066_p3 = scmp.lt.s32.totalorder %s783_s2, %s783_s2 }
  0x40   :  { %p1062_p2 = scmp.ne.s32.totalorder %s783_s2, %s1061_s12  ;;  %p1067_p4 = scmp.lt.s32.totalorder %s1061_s12, %s1061_s12 }
  0x41   :  { %870 = vmatpush3.bf16.msra.mxu0 %v977_v31  ;;  %v221_v22 = vpack.c.bf16 %v206_v19, %v206_v19  ;;  %v207_v23 = vcombine.high %v205_v20, %v205_v20  ;;  %v222_v24 = vpack.c.bf16 %v205_v20, %v205_v20 }
  0x42   :  { %892 = vmatpush3.bf16.msra.mxu1 %v978_v32  ;;  %871 = vmatprep.subr.bf16.mxu0 %v979_v33  ;;  %p1068_p5 = por %p1067_p4, %p1066_p3 }
  0x43   :  { %893 = vmatprep.subr.bf16.mxu1 %v980_v34  ;;  %v223_v25 = vpack.c.bf16 %v207_v23, %v207_v23 }
  0x44   :  { %p1069_p6 = pnand %p1068_p5, %p1062_p2 }
  0x45   :  { %872 = vmatpush3.bf16.msra.mxu0 %v981_v36 }
  0x46   :  { %894 = vmatpush3.bf16.msra.mxu1 %v982_v37  ;;  %901 = vmatprep.subr.bf16.mxu0 %v984_v41 }
  0x47   :  { %923 = vmatprep.subr.bf16.mxu1 %v985_v42 }
  0x48   :  { %648 = vmatmul.mubr.bf16.vlgmr.msra.gmra.mrb[0].mxu0 %v216_v45 }
  0x49   :  { %902 = vmatpush3.bf16.msra.mxu0 %v986_v48  ;;  %688 = vmatmul.mubr.bf16.vlgmr.msra.gmra.mrb[0].mxu1 %v218_v49 }
  0x4a   :  { %903 = vmatprep.subr.bf16.mxu0 %v988_v50  ;;  %924 = vmatpush3.bf16.msra.mxu1 %v987_v52 }
  0x4b   :  { %925 = vmatprep.subr.bf16.mxu1 %v989_v53  ;;  %727 = vmatprep.mubr.bf16.mxu0 %v221_v22 }
  0x4c   :  { %767 = vmatprep.mubr.bf16.mxu1 %v223_v25 }
  0x4d   :  { %904 = vmatpush3.bf16.msra.mxu0 %v990_v54 }
  0x4e   :  { %905 = vmatprep.subr.bf16.mxu0 %v992_v55  ;;  %926 = vmatpush3.bf16.msra.mxu1 %v991_v56 }
  0x4f   :  { %927 = vmatprep.subr.bf16.mxu1 %v993_v57 }
  0x51   :  { %906 = vmatpush3.bf16.msra.mxu0 %v994_v58 }
  0x52   :  { %907 = vmatprep.subr.bf16.mxu0 %v996_v59  ;;  %928 = vmatpush3.bf16.msra.mxu1 %v995_v60 }
  0x53   :  { %929 = vmatprep.subr.bf16.mxu1 %v997_v61 }
  0x55   :  { %908 = vmatpush3.bf16.msra.mxu0 %v998_v62 }
  0x56   :  { %909 = vmatprep.subr.bf16.mxu0 %v1000_v63  ;;  %930 = vmatpush3.bf16.msra.mxu1 %v999_v0 }
  0x57   :  { %931 = vmatprep.subr.bf16.mxu1 %v1001_v1 }
  0x59   :  { %910 = vmatpush3.bf16.msra.mxu0 %v1002_v2 }
  0x5a   :  { %911 = vmatprep.subr.bf16.mxu0 %v1004_v3  ;;  %932 = vmatpush3.bf16.msra.mxu1 %v1003_v4 }
  0x5b   :  { %933 = vmatprep.subr.bf16.mxu1 %v1005_v5 }
  0x5d   :  { %912 = vmatpush3.bf16.msra.mxu0 %v1006_v6 }
  0x5e   :  { %913 = vmatprep.subr.bf16.mxu0 %v1008_v7  ;;  %934 = vmatpush3.bf16.msra.mxu1 %v1007_v8 }
  0x5f   :  { %935 = vmatprep.subr.bf16.mxu1 %v1009_v9 }
  0x61   :  { %914 = vmatpush3.bf16.msra.mxu0 %v1010_v10 }
  0x62   :  { %915 = vmatprep.subr.bf16.mxu0 %v1012_v11  ;;  %936 = vmatpush3.bf16.msra.mxu1 %v1011_v12 }
  0x63   :  { %937 = vmatprep.subr.bf16.mxu1 %v1013_v13 }
  0x65   :  { %916 = vmatpush3.bf16.msra.mxu0 %v1014_v15 }
  0x66   :  { %938 = vmatpush3.bf16.msra.mxu1 %v1015_v18 }
  0x68   :  { %728 = vmatmul.mubr.bf16.vlgmr.msra.gmra.mrb[4].mxu0 %v220_v21 }
  0x69   :  { %768 = vmatmul.mubr.bf16.vlgmr.msra.gmra.mrb[4].mxu1 %v222_v24 }
 0x11b   :  { %v873_v26 = vpop.f32.mrb[0].mxu0 }
 0x11c   :  { %v874_v28 = vpop.f32.mrb[1].mxu0  ;;  %v895_v29 = vpop.f32.mrb[0].mxu1 }
 0x11d   :  { %v875_v30 = vadd.f32 %v874_v28, %v873_v26  ;;  %v876_v31 = vpop.f32.mrb[2].mxu0  ;;  %v896_v32 = vpop.f32.mrb[1].mxu1 }
 0x11e   :  { %v877_v33 = vpop.f32.mrb[3].mxu0  ;;  %v897_v35 = vadd.f32 %v896_v32, %v895_v29  ;;  %v898_v36 = vpop.f32.mrb[2].mxu1 }
 0x11f   :  { %v650_v34 = vadd.f32 %v875_v30, %v792_v27  ;;  %v899_v37 = vpop.f32.mrb[3].mxu1 }
 0x121   :  { %v690_v38 = vadd.f32 %v897_v35, %v650_v34 }
 0x13b   :  { %v917_v39 = vpop.f32.mrb[4].mxu0 }
 0x13c   :  { %v918_v40 = vpop.f32.mrb[5].mxu0  ;;  %v939_v41 = vpop.f32.mrb[4].mxu1 }
 0x13d   :  { %v919_v42 = vadd.f32 %v918_v40, %v917_v39  ;;  %v920_v43 = vpop.f32.mrb[6].mxu0  ;;  %v940_v44 = vpop.f32.mrb[5].mxu1 }
 0x13e   :  { %v921_v45 = vpop.f32.mrb[7].mxu0  ;;  %v941_v47 = vadd.f32 %v940_v44, %v939_v41  ;;  %v942_v48 = vpop.f32.mrb[6].mxu1 }
 0x13f   :  { %v730_v46 = vadd.f32 %v919_v42, %v690_v38  ;;  %v943_v49 = vpop.f32.mrb[7].mxu1 }
 0x141   :  { %v770_v50 = vadd.f32 %v941_v47, %v730_v46 }
 0x143   :  { %775 = vst [vmem:[#allocation7] sm:$0x3] %v770_v50 }
 0x144   :  { %1072 = shalt.err (!%p1069_p6)
}
 0x145   :  { %s1073_s15 = scalar_lea.hbm %s1170_s3, 32 }
 0x146   :  { %p1074_p7 = scmp.ne.s32.totalorder %s1170_s3, %s1073_s15  ;;  %p1077_p8 = scmp.lt.u32.totalorder %s1073_s15, %s1170_s3 }
 0x148   :  { %p1079_p9 = pnand %p1077_p8, %p1074_p7 }
 0x14a   :  { %1082 = shalt.err (!%p1079_p9)
}
 0x14b   :  { %785 = dma.vmem_to_hbm [thread:$0]  %s783_s2, 32, %s1170_s3, [#allocation4]  }
 0x14c   :  { %1087 = dma.done.wait [#allocation4], 32  }
 0x14d   :  { %1088 = vsyncadd [#allocation4], 4294967264 }
 0x14e   :  { %789 = vsyncpa [#allocation3], 1 }
 0x14f   :  { %790 = vsyncpa [#allocation6], 1 }
 0x150   :  { %791 = vsyncpa [#allocation4], 1 }

</bundles_post_ra>
